<compile_context>
chip_gen: v6e
topology: v6e:2x2x1
jax: 0.10.0
libtpu: 0.0.40
codegen_flags: <defaults>
</compile_context>

<pallas_src>
import functools

import jax
import jax.numpy as jnp
from jax import lax
from jax.experimental import pallas as pl
from jax.experimental.pallas import tpu as pltpu

ONE_HOT_EPS = 1e-6  # eps the reference one_hot() adds everywhere


# --------------------------------------------------------------------------- #
# Kernel
# --------------------------------------------------------------------------- #
def _focal_kernel(t_ref, x_ref, o_ref, *, alpha, gamma, eps):
    """Per-tile focal loss.

    x_ref: (C, TM) logits (f32 or bf16)
    t_ref: (1, TM) int32 class labels
    o_ref: (1, TM) float32 per-pixel loss
    """
    x = x_ref[...].astype(jnp.float32)            # (C, TM)
    t = t_ref[...]                                # (1, TM) int32

    # softmax over the class axis (matches F.softmax(input, dim=1))
    m = jnp.max(x, axis=0, keepdims=True)
    e = jnp.exp(x - m)
    denom = jnp.sum(e, axis=0, keepdims=True)     # (1, TM)
    # Approx reciprocal on the EUP + one Newton-Raphson step => ~f32-exact,
    # and only on the (1, TM) row (C-fold cheaper than dividing e itself).
    r = pl.reciprocal(denom, approx=True)
    r = r * (2.0 - denom * r)
    p = e * r + eps                               # input_soft = softmax + eps

    # one_hot(target) + 1e-6 (reference one_hot adds eps everywhere)
    cls = lax.broadcasted_iota(jnp.int32, x.shape, 0)          # (C, TM)
    oh = jnp.where(cls == t, 1.0, 0.0) + ONE_HOT_EPS

    # focal weight (1 - p)^gamma
    base = 1.0 - p
    g = float(gamma)
    if g == int(g) and g >= 0.0:
        ig = int(g)
        if ig == 0:
            weight = jnp.ones_like(p)
        else:
            # integer exponent -> pure VPU multiplies, no EUP transcendentals
            weight = lax.integer_pow(base, ig)
    else:
        # fractional gamma: clamp base >= 0 to avoid NaN when p > 1 (p = softmax + eps)
        # TODO(synk): the PyTorch reference does not clamp and would NaN here.
        weight = jnp.power(jnp.maximum(base, 0.0), g)

    focal = (-alpha) * weight * jnp.log(p)

    # sum over class axis -> (1, TM)
    o_ref[...] = jnp.sum(oh * focal, axis=0, keepdims=True)


# --------------------------------------------------------------------------- #
# Pallas call wrapper
# --------------------------------------------------------------------------- #
def _choose_tile_m(P, C, desired=2048):
    """Pick a lane tile: multiple of 128, divides P, double-buffered tile fits VMEM."""
    # Keep a single logits input buffer <= ~4 MiB so double-buffering stays far
    # below even v5e's 16 MiB scoped-VMEM default, for any C.
    bytes_per_col = max(C, 1) * 4
    max_by_vmem = max(128, ((4 * 1024 * 1024) // bytes_per_col) // 128 * 128)
    t = min(desired, P, max_by_vmem)
    t = max(128, (t // 128) * 128)
    # P is guaranteed to be a multiple of 128 by the caller -> terminates at 128.
    while P % t != 0:
        t -= 128
    return t


def _focal_loss_pixels(logits_ncp, target_n1p, alpha, gamma, eps, tile_m):
    """logits_ncp: (N, C, P), target_n1p: (N, 1, P) i32 -> (N, 1, P) f32 loss."""
    N, C, P = logits_ncp.shape
    assert P % tile_m == 0

    kernel = functools.partial(
        _focal_kernel, alpha=float(alpha), gamma=float(gamma), eps=float(eps)
    )

    out = pl.pallas_call(
        kernel,
        out_shape=jax.ShapeDtypeStruct((N, 1, P), jnp.float32),
        grid_spec=pltpu.PrefetchScalarGridSpec(
            num_scalar_prefetch=0,
            grid=(N, P // tile_m),
            in_specs=[
                # target: (N, 1, P) -> kernel sees (1, tile_m)
                pl.BlockSpec((pl.Squeezed(), 1, tile_m), lambda n, i: (n, 0, i)),
                # logits: (N, C, P) -> kernel sees (C, tile_m); no transpose needed
                pl.BlockSpec((pl.Squeezed(), C, tile_m), lambda n, i: (n, 0, i)),
            ],
            out_specs=pl.BlockSpec((pl.Squeezed(), 1, tile_m), lambda n, i: (n, 0, i)),
        ),
        compiler_params=pltpu.CompilerParams(
            dimension_semantics=("parallel", "parallel"),
        ),
    )(target_n1p, logits_ncp)

    return out


# --------------------------------------------------------------------------- #
# Module
# --------------------------------------------------------------------------- #
class FocalLoss:
    """JAX/Pallas port of the PyTorch FocalLoss module (forward only)."""

    def __init__(self, alpha: float, gamma: float = 2.0,
                 reduction: str = "none", eps: float = 1e-8):
        self.alpha = alpha
        self.gamma = gamma
        self.reduction = reduction
        self.eps = eps

    def __call__(self, logits, target):
        # logits: (N, C, *spatial) float, target: (N, *spatial) int
        logits = jnp.asarray(logits)
        if logits.dtype != jnp.bfloat16:
            # bf16 inputs are kept as-is (halves HBM read traffic); everything
            # else is computed in f32, kernel upcasts internally.
            logits = logits.astype(jnp.float32)
        target = jnp.asarray(target, jnp.int32)

        N, C = logits.shape[0], logits.shape[1]
        spatial = logits.shape[2:]
        assert target.shape == (N,) + spatial

        P = 1
        for s in spatial:
            P *= int(s)

        # Views only — keep NCHW memory order, no transpose pass over HBM.
        logits_ncp = logits.reshape(N, C, P)
        target_n1p = target.reshape(N, 1, P)

        # Minimal padding: only to 128-lane alignment (zero copies if P % 128 == 0,
        # since tile_m is then chosen to divide P exactly).
        pad = (-P) % 128
        if pad:
            logits_ncp = jnp.pad(logits_ncp, ((0, 0), (0, 0), (0, pad)))
            target_n1p = jnp.pad(target_n1p, ((0, 0), (0, 0), (0, pad)))
        Pp = P + pad

        tile_m = _choose_tile_m(Pp, C)

        loss_n1p = _focal_loss_pixels(
            logits_ncp, target_n1p, self.alpha, self.gamma, self.eps, tile_m
        )
        loss_tmp = loss_n1p[:, 0, :P].reshape((N,) + spatial)

        if self.reduction == "none":
            return loss_tmp
        elif self.reduction == "mean":
            return jnp.mean(loss_tmp)
        elif self.reduction == "sum":
            return jnp.sum(loss_tmp)
        else:
            raise NotImplementedError(
                "Invalid reduction mode: {}".format(self.reduction)
            )


# --------------------------------------------------------------------------- #
# Pure-JAX reference (verification)
# --------------------------------------------------------------------------- #
def _reference_focal_loss(logits, target, alpha, gamma, reduction, eps):
    logits = jnp.asarray(logits, jnp.float32)
    p = jax.nn.softmax(logits, axis=1) + eps
    C = logits.shape[1]
    oh = jax.nn.one_hot(target, C, axis=1, dtype=jnp.float32) + ONE_HOT_EPS
    weight = jnp.power(1.0 - p, gamma)
    focal = -alpha * weight * jnp.log(p)
    loss_tmp = jnp.sum(oh * focal, axis=1)
    if reduction == "none":
        return loss_tmp
    if reduction == "mean":
        return jnp.mean(loss_tmp)
    return jnp.sum(loss_tmp)


if __name__ == "__main__":
    key = jax.random.PRNGKey(0)
    k1, k2, k3, k4 = jax.random.split(key, 4)

    # Case 1: lane-aligned spatial (no padding path), reduction='none'
    N, C, H, W = 2, 4, 16, 16
    logits = jax.random.normal(k1, (N, C, H, W), dtype=jnp.float32)
    target = jax.random.randint(k2, (N, H, W), 0, C, dtype=jnp.int32)

    criterion = FocalLoss(alpha=0.5, gamma=2.0, reduction="none", eps=1e-8)
    out = jax.block_until_ready(criterion(logits, target))
    ref = _reference_focal_loss(logits, target, 0.5, 2.0, "none", 1e-8)
    assert out.shape == (N, H, W)
    assert jnp.allclose(out, ref, atol=1e-5, rtol=1e-5)

    # Case 2: mean reduction
    criterion_mean = FocalLoss(alpha=0.25, gamma=2.0, reduction="mean")
    out_mean = jax.block_until_ready(criterion_mean(logits, target))
    ref_mean = _reference_focal_loss(logits, target, 0.25, 2.0, "mean", 1e-8)
    assert jnp.allclose(out_mean, ref_mean, atol=1e-5, rtol=1e-5)

    # Case 3: unaligned spatial (exercises the minimal pad + tail discard), 'sum'
    N2, C2, H2, W2 = 1, 5, 3, 5
    logits2 = jax.random.normal(k3, (N2, C2, H2, W2), dtype=jnp.float32)
    target2 = jax.random.randint(k4, (N2, H2, W2), 0, C2, dtype=jnp.int32)
    criterion_sum = FocalLoss(alpha=0.5, gamma=2.0, reduction="sum")
    out_sum = jax.block_until_ready(criterion_sum(logits2, target2))
    ref_sum = _reference_focal_loss(logits2, target2, 0.5, 2.0, "sum", 1e-8)
    assert jnp.allclose(out_sum, ref_sum, atol=1e-4, rtol=1e-5)

    print("KERNEL_OK")
</pallas_src>

<mosaic_0001>
module attributes {stable_mosaic.version = 11 : i64} {
  func.func @_focal_kernel(%arg0: i32, %arg1: i32, %arg2: memref<1x1x256xi32, #tpu.memory_space<vmem>>, %arg3: memref<1x4x256xf32, #tpu.memory_space<vmem>>, %arg4: memref<1x1x256xf32, #tpu.memory_space<vmem>>) attributes {dimension_semantics = [#tpu.dimension_semantics<parallel>, #tpu.dimension_semantics<parallel>], iteration_bounds = array<i64: 2, 1>, scalar_prefetch = 0 : i64, scratch_operands = 0 : i64, tpu.core_type = #tpu.core_type<tc>, window_params = [{transform_indices = @transform_0, window_bounds = array<i64: 1, 1, 256>}, {transform_indices = @transform_1, window_bounds = array<i64: 1, 4, 256>}, {transform_indices = @transform_2, window_bounds = array<i64: 1, 1, 256>}]} {
    %c0 = arith.constant 0 : index
    %c0_0 = arith.constant 0 : index
    %c0_1 = arith.constant 0 : index
    %0 = vector.load %arg3[%c0, %c0_0, %c0_1] : memref<1x4x256xf32, #tpu.memory_space<vmem>>, vector<1x4x256xf32>
    %1 = vector.shape_cast %0 : vector<1x4x256xf32> to vector<4x256xf32>
    %c0_2 = arith.constant 0 : index
    %c0_3 = arith.constant 0 : index
    %c0_4 = arith.constant 0 : index
    %2 = vector.load %arg2[%c0_2, %c0_3, %c0_4] : memref<1x1x256xi32, #tpu.memory_space<vmem>>, vector<1x1x256xi32>
    %3 = vector.shape_cast %2 : vector<1x1x256xi32> to vector<1x256xi32>
    %cst = arith.constant dense<0xFF800000> : vector<256xf32>
    %4 = vector.multi_reduction <maximumf>, %1, %cst [0] : vector<4x256xf32> to vector<256xf32>
    %5 = vector.shape_cast %4 : vector<256xf32> to vector<1x256xf32>
    %6 = vector.broadcast %5 : vector<1x256xf32> to vector<4x256xf32>
    %7 = arith.subf %1, %6 : vector<4x256xf32>
    %8 = math.exp %7 : vector<4x256xf32>
    %cst_5 = arith.constant dense<0.000000e+00> : vector<256xf32>
    %9 = vector.multi_reduction <add>, %8, %cst_5 [0] : vector<4x256xf32> to vector<256xf32>
    %10 = vector.shape_cast %9 : vector<256xf32> to vector<1x256xf32>
    %11 = tpu.reciprocal %10 {approx = true} : vector<1x256xf32> -> vector<1x256xf32>
    %12 = arith.mulf %10, %11 : vector<1x256xf32>
    %cst_6 = arith.constant 2.000000e+00 : f32
    %13 = vector.broadcast %cst_6 : f32 to vector<1x256xf32>
    %14 = arith.subf %13, %12 : vector<1x256xf32>
    %15 = arith.mulf %11, %14 : vector<1x256xf32>
    %16 = vector.broadcast %15 : vector<1x256xf32> to vector<4x256xf32>
    %17 = arith.mulf %8, %16 : vector<4x256xf32>
    %cst_7 = arith.constant 9.99999993E-9 : f32
    %18 = vector.broadcast %cst_7 : f32 to vector<4x256xf32>
    %19 = arith.addf %17, %18 : vector<4x256xf32>
    %20 = tpu.iota {dimensions = array<i32: 0>} : vector<4x256xi32>
    %21 = vector.broadcast %3 : vector<1x256xi32> to vector<4x256xi32>
    %22 = arith.cmpi eq, %20, %21 : vector<4x256xi32>
    %cst_8 = arith.constant 1.000000e+00 : f32
    %cst_9 = arith.constant 0.000000e+00 : f32
    %23 = vector.broadcast %cst_8 : f32 to vector<4x256xf32>
    %24 = vector.broadcast %cst_9 : f32 to vector<4x256xf32>
    %25 = arith.select %22, %23, %24 : vector<4x256xi1>, vector<4x256xf32>
    %cst_10 = arith.constant 9.99999997E-7 : f32
    %26 = vector.broadcast %cst_10 : f32 to vector<4x256xf32>
    %27 = arith.addf %25, %26 : vector<4x256xf32>
    %cst_11 = arith.constant 1.000000e+00 : f32
    %28 = vector.broadcast %cst_11 : f32 to vector<4x256xf32>
    %29 = arith.subf %28, %19 : vector<4x256xf32>
    %30 = arith.mulf %29, %29 : vector<4x256xf32>
    %cst_12 = arith.constant -5.000000e-01 : f32
    %31 = vector.broadcast %cst_12 : f32 to vector<4x256xf32>
    %32 = arith.mulf %31, %30 : vector<4x256xf32>
    %33 = math.log %19 : vector<4x256xf32>
    %34 = arith.mulf %32, %33 : vector<4x256xf32>
    %35 = arith.mulf %27, %34 : vector<4x256xf32>
    %cst_13 = arith.constant dense<0.000000e+00> : vector<256xf32>
    %36 = vector.multi_reduction <add>, %35, %cst_13 [0] : vector<4x256xf32> to vector<256xf32>
    %37 = vector.shape_cast %36 : vector<256xf32> to vector<1x256xf32>
    %c0_14 = arith.constant 0 : index
    %c0_15 = arith.constant 0 : index
    %c0_16 = arith.constant 0 : index
    %38 = vector.load %arg4[%c0_14, %c0_15, %c0_16] : memref<1x1x256xf32, #tpu.memory_space<vmem>>, vector<1x1x256xf32>
    %39 = vector.shape_cast %38 : vector<1x1x256xf32> to vector<1x256xf32>
    %40 = vector.shape_cast %37 : vector<1x256xf32> to vector<1x1x256xf32>
    tpu.vector_store %arg4[%c0_14, %c0_15, %c0_16], %40 {strides = array<i32>} : memref<1x1x256xf32, #tpu.memory_space<vmem>>, vector<1x1x256xf32>,
    return
  }
  func.func @transform_0(%arg0: i32, %arg1: i32) -> (i32, i32, i32) {
    %c0_i32 = arith.constant 0 : i32
    %c0_i32_0 = arith.constant 0 : i32
    return %arg0, %c0_i32, %arg1 : i32, i32, i32
  }
  func.func @transform_1(%arg0: i32, %arg1: i32) -> (i32, i32, i32) {
    %c0_i32 = arith.constant 0 : i32
    %c0_i32_0 = arith.constant 0 : i32
    return %arg0, %c0_i32, %arg1 : i32, i32, i32
  }
  func.func @transform_2(%arg0: i32, %arg1: i32) -> (i32, i32, i32) {
    %c0_i32 = arith.constant 0 : i32
    %c0_i32_0 = arith.constant 0 : i32
    return %arg0, %c0_i32, %arg1 : i32, i32, i32
  }
}

</mosaic_0001>

<bundles_post_ra>
// kernel: tpu_custom_call.1
= control target key start
LH: loop header
LB: loop body
LE: loop exit
PB: predicated region body
PF: predicated region fallthrough
CT: control target
= control target key end

     0   :  { %7 = vsyncpa [#allocation3], 0  ;;  %s911_s0 = inlined_call_operand.hbm [shape: s32[2,1,256], index: 0, kind: input, shape index: {}]   ;;  %s912_s1 = inlined_call_operand.hbm [shape: f32[2,4,256], index: 1, kind: input, shape index: {}]   ;;  %s913_s2 = inlined_call_operand.hbm [shape: f32[2,1,256], index: 2, kind: output, shape index: {}]  }
   0x1   :  { %9 = vsyncpa [#allocation3 + $0x1], 0 }
   0x2   :  { %10 = vsyncpa [#allocation6], 0 }
   0x3   :  { %12 = vsyncpa [#allocation6 + $0x1], 0 }
   0x4   :  { %13 = vsyncpa [#allocation4], 0 }
   0x5   :  { %15 = vsyncpa [#allocation4 + $0x1], 0  ;;  %s734_s9 = smov 0   ;;  %s736_s10 = smov 0  }
   0x6   :  { %s738_s11 = smov 0   ;;  %s740_s12 = smov 0  }
   0x7   :  { %s742_s13 = smov 0   ;;  %s744_s14 = smov 0  }
   0x8 LB: > { %s472_s15 = sadd.s32 4294967295, %s712_s14   ;;  %s473_s16 = sadd.s32 4294967294, %s712_s14   ;;  %s712_s14 = sphi %s744_s14, %s21_s14   ;;  %s708_s13 = sphi %s742_s13, %s925_s13   ;;  %s704_s12 = sphi %s740_s12, %s924_s12   ;;  %s700_s11 = sphi %s738_s11, %s923_s11   ;;  %s696_s10 = sphi %s736_s10, %s922_s10   ;;  %s692_s9 = sphi %s734_s9, %s921_s9  }
   0x9   : > { %s33_s17 = sadd.s32 1, %s708_s13  ;;  %s42_s18 = sadd.s32 1, %s700_s11 }
   0xa   : > { %p35_p0 = scmp.ge.s32.totalorder %s33_s17, 2  ;;  %p49_p1 = scmp.ne.s32.totalorder %s700_s11, %s696_s10 }
   0xb   : > { %p50_p2 = scmp.eq.s32.totalorder %s712_s14, 0  ;;  %p55_p3 = scmp.ne.s32.totalorder %s696_s10, %s692_s9 }
   0xc   : > { %s927_s17 = smov (%p35_p0, %s33_s17), 0  ;;  %p56_p5 = scmp.eq.s32.totalorder %s472_s15, 0 }
   0xd   : > { %p775_p4 = por %p50_p2, %p49_p1  ;;  %s37_s20 = ssub.s32 %s708_s13, %s927_s17 }
   0xe   : > { %p109_p6 = scmp.eq.s32.totalorder %s472_s15, 1  ;;  %p40_p7 = scmp.eq.s32.totalorder %s37_s20, 0 }
   0xf   : > { %p781_p8 = por %p56_p5, %p55_p3  ;;  %p115_p10 = scmp.eq.s32.totalorder %s473_s16, 1 }
  0x10   : > { %p785_p9 = por %p109_p6, %p49_p1  ;;  %p511_p13 = scmp.lt.s32.totalorder %s712_s14, 2 }
  0x11   : > { %s790_s23 = scalar_select %p40_p7, %s700_s11, %s42_s18  }
  0x12   : > { %p792_p11 = por %p115_p10, %p55_p3  ;;  %s799_s25 = sand.u32 1, %s700_s11  }
  0x13   : > { %s476_s26 = sshll.u32 %s799_s25, 1  ;;  %s491_s27 = sshll.u32 %s708_s13, 5 }
  0x14   : > { %s147_s30 = scalar_lea.hbm %s911_s0, %s491_s27  ;;  %s139_s3 = scalar_lea.vmem [#allocation2], %s476_s26 }
  0x15   : > { %s149_s4 = sshll.u32 %s139_s3, 4  ;;  %p808_p0 = pnand %p511_p13, %p775_p4  ;;  %s150_s4 = int_to_ptr.vmem [resolvable:$true] %s149_s4 }
  0x16   : > { %p482_p1 = scmp.ge.s32.totalorder %s712_s14, 1  ;;  %p175_p2 = scmp.lt.s32.totalorder %s712_s14, 3 }
  0x17   : > { %s136_s6 = scalar_lea.sflag [#allocation3], %s799_s25  ;;  %p574_p3 = pneg %p808_p0 }
  0x18   : > { %s585_s7 = scalar_lea.vmem %s150_s4, 32  ;;  %s714_s8 = smov [#allocation2]  }
  0x19   : > { %p586_p5 = scmp.ne.s32.totalorder %s150_s4, %s585_s7  ;;  %s590_s15 = sshll.u32 %s714_s8, 4  ;;  %s591_s15 = int_to_ptr.vmem [resolvable:$false] %s590_s15 }
  0x1a   : > { %s592_s16 = scalar_lea.vmem %s591_s15, 64  ;;  %p593_p4 = scmp.lt.s32.totalorder %s150_s4, %s591_s15 }
  0x1b   : > { %p588_p6 = pnand %p586_p5, %p574_p3  ;;  %p594_p10 = scmp.lt.s32.totalorder %s592_s16, %s585_s7 }
  0x1d   : > { %p589_p7 = pneg %p588_p6  ;;  %p595_p13 = por %p594_p10, %p593_p4 }
  0x1f   : > { %p596_p12 = pnand %p595_p13, %p589_p7 }
  0x21   : > { %599 = shalt.err (!%p596_p12)
}
  0x22   : > { %503 = dma.hbm_to_vmem [thread:$0]  (!%p808_p0), %s147_s30, 32, %s150_s4, %s136_s6  }
  0x23   : > { %p826_p5 = pnand %p482_p1, %p175_p2  ;;  %s479_s19 = sshll.u32 %s799_s25, 3 }
  0x24   : > { %s492_s20 = sshll.u32 %s708_s13, 7  ;;  %s160_s29 = scalar_lea.vmem [#allocation5], %s479_s19 }
  0x25   : > { %s168_s28 = scalar_lea.hbm %s912_s1, %s492_s20  ;;  %s170_s3 = sshll.u32 %s160_s29, 4  ;;  %s171_s3 = int_to_ptr.vmem [resolvable:$true] %s170_s3 }
  0x26   : > { %s157_s7 = scalar_lea.sflag [#allocation6], %s799_s25  ;;  %s613_s8 = scalar_lea.vmem %s171_s3, 128 }
  0x27   : > { %p614_p12 = scmp.ne.s32.totalorder %s171_s3, %s613_s8  ;;  %s715_s30 = smov [#allocation5]  }
  0x28   : > { %s618_s4 = sshll.u32 %s715_s30, 4  ;;  %s619_s4 = int_to_ptr.vmem [resolvable:$false] %s618_s4 }
  0x29   : > { %p616_p6 = pnand %p614_p12, %p574_p3  ;;  %s620_s6 = scalar_lea.vmem %s619_s4, 256 }
  0x2a   : > { %p621_p1 = scmp.lt.s32.totalorder %s171_s3, %s619_s4  ;;  %p622_p2 = scmp.lt.s32.totalorder %s620_s6, %s613_s8 }
  0x2b   : > { %p617_p7 = pneg %p616_p6 }
  0x2c   : > { %p623_p4 = por %p622_p2, %p621_p1 }
  0x2e   : > { %p624_p10 = pnand %p623_p4, %p617_p7 }
  0x30   : > { %627 = shalt.err (!%p624_p10)
}
  0x31   : > { %506 = dma.hbm_to_vmem [thread:$0]  (!%p808_p0), %s168_s28, 128, %s171_s3, %s157_s7  }
  0x32   : > { %179 = sbr.rel (%p826_p5) target bundleno = 190 (0xbe), region = 28  ;;  %s844_s25 = sand.u32 (!%p826_p5), 1, %s696_s10  }
  0x33   : > { %s483_s15 = sshll.u32 (!%p826_p5), %s844_s25, 1  ;;  %s182_s16 = scalar_lea.sflag (!%p826_p5), [#allocation3], %s844_s25 }
  0x34   : > { %s850_s19 = scalar_lea.vmem (!%p826_p5), [#allocation2], %s483_s15 }
  0x37   : > { %679 = dma.done.wait (%p781_p8), %s182_s16, 32  }
  0x38   : > { %681 = vsyncadd (%p781_p8), %s182_s16, 4294967264  ;;  %s484_s5 = sshll.u32 %s844_s25, 3  ;;  %s191_s18 = scalar_lea.sflag [#allocation6], %s844_s25 }
  0x39   : > { %s194_s20 = scalar_lea.vmem [#allocation5], %s484_s5 }
  0x3a   : > { %683 = dma.done.wait (%p781_p8), %s191_s18, 128  }
  0x3b   : > { %685 = vsyncadd (%p781_p8), %s191_s18, 4294967168  ;;  %vm228_vm0 = vcmask 1043456   ;;  %v223_v0 = vld [vmem:[%s194_s20] sm:$0xff]  ;;  %v281_v43 = vlaneseq  ;;  %v224_v49 = vld [vmem:[%s850_s19] sm:$0x3]  ;;  %v716_v55 = vmov 0.0  }
  0x3c   : > { %v226_v1 = vcombine.high %v223_v0, %v223_v0  ;;  %v229_v2 = vsel %vm228_vm0, %v223_v0, -inf  ;;  %s219_s21 = scalar_lea.vmem [#allocation7], %s483_s15  ;;  %s493_s27 = sshll.u32 %s704_s12, 5 }
  0x3d   : > { %v230_v3 = vrot.slane %v229_v2, 4  ;;  %v282_v46 = vshrl.u32 %v281_v43, 7  ;;  %s362_s26 = sshll.u32 %s219_s21, 4  ;;  %vm342_vm3 = vcmp.lt.s32.totalorder %v281_v43, 256  ;;  %s360_s3 = scalar_lea.hbm %s913_s2, %s493_s27  ;;  %s363_s26 = int_to_ptr.vmem [resolvable:$true] %s362_s26 }
  0x3e   : > { %v236_v4 = vsel %vm228_vm0, %v226_v1, -inf  ;;  %s346_s7 = scalar_lea.sflag [#allocation4], %s844_s25  ;;  %s628_s8 = scalar_lea.vmem %s363_s26, 32 }
  0x3f   : > { %v231_v5 = vmax.f32 %v229_v2, %v230_v3  ;;  %v237_v6 = vrot.slane %v236_v4, 4  ;;  %v285_v48 = vsub.s32 0, %v282_v46  ;;  %v289_v50 = vsub.s32 1, %v282_v46  ;;  %p629_p8 = scmp.ne.s32.totalorder %s363_s26, %s628_s8  ;;  %s718_s30 = smov [#allocation7]  }
  0x40   : > { %s632_s4 = sshll.u32 %s718_s30, 4  ;;  %s633_s4 = int_to_ptr.vmem [resolvable:$false] %s632_s4 }
  0x41   : > { %v232_v7 = vrot.slane %v231_v5, 2  ;;  %v238_v8 = vmax.f32 %v236_v4, %v237_v6  ;;  %v286_v51 = vrot.slane %v224_v49, %v285_v48  ;;  %v290_v53 = vrot.slane %v224_v49, %v289_v50  ;;  %p630_p0 = pnand %p629_p8, %p785_p9  ;;  %s634_s6 = scalar_lea.vmem %s633_s4, 64 }
  0x42   : > { %p635_p13 = scmp.lt.s32.totalorder %s363_s26, %s633_s4  ;;  %p636_p5 = scmp.lt.s32.totalorder %s634_s6, %s628_s8 }
  0x43   : > { %v233_v9 = vmax.f32 %v231_v5, %v232_v7  ;;  %v239_v10 = vrot.slane %v238_v8, 2  ;;  %vm291_vm1 = vcmp.eq.s32.totalorder %v282_v46, %v286_v51  ;;  %vm292_vm2 = vcmp.eq.s32.totalorder %v282_v46, %v290_v53  ;;  %p631_p3 = pneg %p630_p0 }
  0x44   : > { %v293_v56 = vsel %vm291_vm1, 1.0, %v716_v55  ;;  %v294_v59 = vsel %vm292_vm2, 1.0, %v716_v55  ;;  %p637_p12 = por %p636_p5, %p635_p13 }
  0x45   : > { %v234_v11 = vrot.slane %v233_v9, 1  ;;  %v240_v12 = vmax.f32 %v238_v8, %v239_v10  ;;  %v295_v60 = vadd.f32 1e-06, %v293_v56  ;;  %v296_v62 = vadd.f32 1e-06, %v294_v59 }
  0x46   : > { %v717_v10 = vmov 1966171168   ;;  %p638_p6 = pnand %p637_p12, %p631_p3 }
  0x47   : > { %v235_v13 = vmax.f32 %v233_v9, %v234_v11  ;;  %v241_v14 = vrot.slane %v240_v12, 1  ;;  %v326_v11 = vunpack.c.l.s4 %v717_v10 }
  0x49   : > { %v242_v15 = vmax.f32 %v240_v12, %v241_v14 }
  0x4b   : > { %v245_v16 = vcombine.low %v235_v13, %v242_v15 }
  0x4d   : > { %v247_v17 = vsub.f32 %v223_v0, %v245_v16  ;;  %v327_v16 = vunpack.c.0.s8 %v326_v11 }
  0x4f   : > { %v248_v18 = vmul.f32 1.442695, %v247_v17 }
  0x51   : > { %564 = vpow2.f32 %v248_v18 }
  0x5e   : > { %v565_v19 = vpop.eup %564 }
  0x5f   : > { %v251_v20 = vcombine.high %v565_v19, %v565_v19  ;;  %v253_v21 = vsel %vm228_vm0, %v565_v19, 0.0 }
  0x60   : > { %v254_v22 = vrot.slane %v253_v21, 4 }
  0x61   : > { %v260_v23 = vsel %vm228_vm0, %v251_v20, 0.0  ;;  %v330_v20 = vsub.s32 %v327_v16, %v282_v46 }
  0x62   : > { %v255_v24 = vadd.f32 %v254_v22, %v253_v21  ;;  %v261_v25 = vrot.slane %v260_v23, 4 }
  0x64   : > { %v256_v26 = vrot.slane %v255_v24, 2  ;;  %v262_v27 = vadd.f32 %v261_v25, %v260_v23 }
  0x66   : > { %v257_v28 = vadd.f32 %v256_v26, %v255_v24  ;;  %v263_v29 = vrot.slane %v262_v27, 2 }
  0x68   : > { %v258_v30 = vrot.slane %v257_v28, 1  ;;  %v264_v31 = vadd.f32 %v263_v29, %v262_v27 }
  0x6a   : > { %v259_v32 = vadd.f32 %v258_v30, %v257_v28  ;;  %v265_v33 = vrot.slane %v264_v31, 1 }
  0x6c   : > { %v266_v34 = vadd.f32 %v265_v33, %v264_v31  ;;  %566 = vrcp.f32 %v259_v32 }
  0x6e   : > { %568 = vrcp.f32 %v266_v34 }
  0x79   : > { %v567_v35 = vpop.eup %566 }
  0x7a   : > { %v269_v36 = vmul.f32 %v567_v35, %v259_v32 }
  0x7b   : > { %v569_v37 = vpop.eup %568 }
  0x7c   : > { %v270_v38 = vmul.f32 %v569_v37, %v266_v34  ;;  %v271_v39 = vsub.f32 2.0, %v269_v36 }
  0x7e   : > { %v272_v40 = vsub.f32 2.0, %v270_v38  ;;  %v273_v41 = vmul.f32 %v567_v35, %v271_v39 }
  0x80   : > { %v274_v42 = vmul.f32 %v569_v37, %v272_v40 }
  0x82   : > { %v277_v44 = vcombine.low %v273_v41, %v274_v42 }
  0x84   : > { %v279_v45 = vmul.f32 %v565_v19, %v277_v44 }
  0x86   : > { %v280_v47 = vadd.f32 1e-08, %v279_v45 }
  0x88   : > { %570 = vlog2.f32 %v280_v47  ;;  %v297_v52 = vsub.f32 1.0, %v280_v47 }
  0x8a   : > { %v298_v54 = vmul.f32 %v297_v52, %v297_v52 }
  0x8c   : > { %v299_v57 = vmul.f32 -0.5, %v298_v54 }
  0x95   : > { %v571_v58 = vpop.eup %570 }
  0x96   : > { %v301_v61 = vmul.f32 0.6931472, %v571_v58 }
  0x98   : > { %v302_v63 = vmul.f32 %v301_v61, %v299_v57 }
  0x9a   : > { %v304_v0 = vcombine.high %v302_v63, %v302_v63  ;;  %v306_v1 = vmul.f32 %v302_v63, %v295_v60 }
  0x9c   : > { %v307_v2 = vmul.f32 %v304_v0, %v296_v62  ;;  %v308_v3 = vsel %vm228_vm0, %v306_v1, 0.0 }
  0x9d   : > { %v309_v4 = vrot.slane %v308_v3, 4 }
  0x9e   : > { %v315_v5 = vsel %vm228_vm0, %v307_v2, 0.0 }
  0x9f   : > { %v310_v6 = vadd.f32 %v309_v4, %v308_v3  ;;  %v316_v7 = vrot.slane %v315_v5, 4 }
  0xa1   : > { %v311_v8 = vrot.slane %v310_v6, 2  ;;  %v317_v9 = vadd.f32 %v316_v7, %v315_v5 }
  0xa3   : > { %v312_v12 = vadd.f32 %v311_v8, %v310_v6  ;;  %v318_v13 = vrot.slane %v317_v9, 2 }
  0xa5   : > { %v313_v14 = vrot.slane %v312_v12, 1  ;;  %v319_v15 = vadd.f32 %v318_v13, %v317_v9 }
  0xa7   : > { %v314_v17 = vadd.f32 %v313_v14, %v312_v12  ;;  %v320_v18 = vrot.slane %v319_v15, 1 }
  0xa9   : > { %v321_v19 = vadd.f32 %v320_v18, %v319_v15 }
  0xab   : > { %v324_v21 = vcombine.low %v314_v17, %v321_v19 }
  0xad   : > { %v331_v22 = vrot.slane %v324_v21, %v330_v20 }
  0xaf   : > { %v338_v23 = vrot.slane %v331_v22, %v330_v20 }
  0xb1   : > { %344 = vst.msk [vmem:[%s219_s21] sm:$0x3] %vm342_vm3, %v338_v23 }
  0xb2   : > { %641 = shalt.err (!%p638_p6)
}
  0xb3   : > { %s642_s12 = scalar_lea.hbm %s360_s3, 32  ;;  %s646_s16 = scalar_lea.hbm %s913_s2, 64 }
  0xb4   : > { %p643_p7 = scmp.ne.s32.totalorder %s360_s3, %s642_s12  ;;  %p647_p4 = scmp.lt.s32.totalorder %s360_s3, %s913_s2 }
  0xb5   : > { %p648_p10 = scmp.lt.s32.totalorder %s646_s16, %s642_s12 }
  0xb6   : > { %p644_p1 = pnand %p643_p7, %p785_p9 }
  0xb7   : > { %p649_p8 = por %p648_p10, %p647_p4 }
  0xb8   : > { %p645_p2 = pneg %p644_p1 }
  0xba   : > { %p650_p0 = pnand %p649_p8, %p645_p2 }
  0xbc   : > { %653 = shalt.err (!%p650_p0)
}
  0xbd   : > { %498 = dma.vmem_to_hbm [thread:$0]  (%p785_p9), %s363_s26, 32, %s360_s3, %s346_s7  }
  0xbe PF: > { %s374_s18 = sand.u32 1, %s692_s9   ;;  %p920_p3 = scmp.ge.s32.totalorder %s712_s14, 2 }
  0xbf   : > { %s375_s20 = scalar_lea.sflag [#allocation4], %s374_s18 }
  0xc0   : > { %p508_p13 = pnand %p920_p3, %p792_p11 }
  0xc2   : > { %p509_p5 = pneg %p508_p13 }
  0xc4   : > { %687 = dma.done.wait (%p509_p5), %s375_s20, 32  }
  0xc5   : > { %689 = vsyncadd (%p509_p5), %s375_s20, 4294967264  ;;  %s21_s14 = sadd.s32 1, %s712_s14   ;;  %s921_s9 = smov %s696_s10 }
  0xc6   : > { %p18_p12 = scmp.ge.s32.totalorder %s21_s14, 4   ;;  %s922_s10 = smov %s700_s11 }
  0xc7   : > { %s923_s11 = smov %s790_s23  ;;  %s924_s12 = smov %s708_s13 }
  0xc8   : > { %s925_s13 = smov %s927_s17  ;;  %20 = sbr.rel (!%p18_p12) target bundleno = 8 (0x8), region = 86 }
  0xcd   :  { %380 = vsyncpa [#allocation3], 1 }
  0xce   :  { %382 = vsyncpa [#allocation3 + $0x1], 1 }
  0xcf   :  { %383 = vsyncpa [#allocation6], 1 }
  0xd0   :  { %385 = vsyncpa [#allocation6 + $0x1], 1 }
  0xd1   :  { %386 = vsyncpa [#allocation4], 1 }
  0xd2   :  { %388 = vsyncpa [#allocation4 + $0x1], 1 }

</bundles_post_ra>
